<compile_context>
chip_gen: v5e
topology: v5e:2x2
jax: 0.10.0
libtpu: 0.0.40
codegen_flags: <defaults>
</compile_context>

<pallas_src>
import functools

import numpy as np
import jax
import jax.numpy as jnp
from jax import lax
from jax.experimental import pallas as pl
from jax.experimental.pallas import tpu as pltpu

DIMS = [64, 128, 256, 512, 512, 512, 512]
KERNELS = [5, 3, 3, 3, 3, 3, 3]
STRIDES = [1, 2, 2, 2, 2, 2, 2]
NEG_SLOPE = 0.2        # LeakyReLU slope

TARGET_M = 512         # flattened output rows per grid step (perf review: 256-512)
TARGET_K = 256         # MXU contraction width on v6e/v7x


@functools.lru_cache(maxsize=1)
def _vmem_limit_bytes():
    """Per-generation scoped-VMEM limit (v7x: 64 MiB physical, v5e/v6e: 128 MiB)."""
    cap = 64 * 1024 * 1024
    try:
        info = pltpu.get_tpu_info()
        cap = int(getattr(info, "vmem_capacity_bytes", cap) or cap)
    except Exception:
        pass
    return int(min(cap * 3 // 4, 100 * 1024 * 1024))


def _conv_block_kernel(x_ref, w_ref, b_ref, o_ref, acc_ref, *slab,
                       groups, tile_h, out_w):
    """One grid step of conv + bias + LeakyReLU on an (NB, tile_h, Wo, Cout) tile.

    x_ref   : [NB, 1, P, tile_h + qk, Wq, Cin]   phase-split input rows (+ halo)
    w_ref   : [G, g*Cin, Cout]                    tap-group-fused weights
    b_ref   : [1, Cout]                           bias (f32)
    o_ref   : [NB, tile_h, out_w, Cout]           output tile
    acc_ref : [NB*tile_h*out_w, Cout] f32         VMEM accumulator scratch
    slab    : optional [NB*tile_h*out_w, g*Cin]   VMEM im2col slab scratch
    groups  : static tuple of tap groups; each tap is (phase, qi, qj)
    """
    nb = x_ref.shape[0]
    cin = x_ref.shape[-1]
    cout = acc_ref.shape[-1]
    m = nb * tile_h * out_w

    def tap_patch(phase, qi, qj):
        patch = x_ref[:, 0, phase, qi:qi + tile_h, qj:qj + out_w, :]
        return patch.reshape(m, cin)

    for gi, group in enumerate(groups):
        kg = len(group) * cin
        if len(group) == 1:
            lhs = tap_patch(*group[0])
        else:
            slab_ref = slab[0]
            for t, (phase, qi, qj) in enumerate(group):
                slab_ref[:, t * cin:(t + 1) * cin] = tap_patch(phase, qi, qj)
            lhs = slab_ref[:, 0:kg]
        contrib = jnp.dot(lhs, w_ref[gi, 0:kg, :],
                          preferred_element_type=jnp.float32)
        if gi == 0:
            acc_ref[...] = contrib
        else:
            acc_ref[...] += contrib

    y = acc_ref[...] + b_ref[...]                    # bias, f32
    y = jnp.where(y >= 0.0, y, NEG_SLOPE * y)        # LeakyReLU(0.2), f32
    o_ref[...] = y.reshape(nb, tile_h, out_w, cout).astype(o_ref.dtype)


def encoder_block(x, w, b, k, s, *, act_dtype=jnp.float32):
    """Conv2d(k, stride=s, pad=k//2) + bias + LeakyReLU(0.2) as a Pallas kernel.

    x: [N, H, W, Cin] (NHWC), w: [k, k, Cin, Cout] (HWIO), b: [Cout].
    Returns [N, Ho, Wo, Cout] in act_dtype.
    """
    N, H, W, Cin = x.shape
    Cout = w.shape[-1]
    p = k // 2
    Ho = (H + 2 * p - k) // s + 1
    Wo = (W + 2 * p - k) // s + 1
    qk = (k - 1) // s
    Hq, Wq = Ho + qk, Wo + qk
    P = s * s

    x = x.astype(act_dtype)
    w = w.astype(act_dtype)
    bytes_act = jnp.dtype(act_dtype).itemsize

    # ---- tap grouping: fuse taps so the matmul K dim is ~TARGET_K wide ---------
    g = max(1, min(k * k, TARGET_K // max(Cin, 1)))
    taps = [((i % s) * s + (j % s), i // s, j // s, i, j)
            for i in range(k) for j in range(k)]
    n_groups = -(-len(taps) // g)
    groups, w_groups = [], []
    for gi in range(n_groups):
        chunk = taps[gi * g:(gi + 1) * g]
        groups.append(tuple((ph, qi, qj) for (ph, qi, qj, _, _) in chunk))
        wg = jnp.concatenate([w[i, j] for (_, _, _, i, j) in chunk], axis=0)
        if len(chunk) < g:                       # ragged last group: zero-pad rows
            wg = jnp.pad(wg, ((0, (g - len(chunk)) * Cin), (0, 0)))
        w_groups.append(wg)
    w_f = jnp.stack(w_groups, axis=0)            # [G, g*Cin, Cout]
    b2 = b.reshape(1, Cout).astype(jnp.float32)

    # ---- tile selection: row-tile large layers, batch-fold small ones ----------
    per_img_m = Ho * Wo
    if per_img_m >= TARGET_M:
        nb, tile_h = 1, max(1, TARGET_M // Wo)
    else:
        nb, tile_h = min(N, max(1, TARGET_M // per_img_m)), Ho

    def clamp_tile(th):
        if th >= Ho:
            return Ho
        return min(Ho, max(8, (th // 8) * 8))    # multiple of 8 when row-tiling

    tile_h = clamp_tile(tile_h)
    vmem_limit = _vmem_limit_bytes()
    budget = int(vmem_limit * 0.8)

    def tile_bytes(nb_, th_):
        m_ = nb_ * th_ * Wo
        xin = nb_ * P * (th_ + qk) * Wq * Cin * bytes_act * 2   # double-buffered
        xout = m_ * Cout * bytes_act * 2
        wts = int(w_f.size) * bytes_act * 2
        acc = m_ * Cout * 4
        slab_b = m_ * g * Cin * bytes_act if g > 1 else 0
        return xin + xout + wts + acc + slab_b + 2 * Cout * 4

    for _ in range(32):
        if tile_bytes(nb, tile_h) <= budget:
            break
        if nb > 1:
            nb = max(1, nb // 2)
        elif tile_h > 8:
            new_th = clamp_tile(max(8, tile_h // 2))
            if new_th == tile_h:
                break
            tile_h = new_th
        else:
            break

    T = -(-Ho // tile_h)
    if T == 1:
        tile_h = Ho
    n_pad = -(-N // nb) * nb

    # ---- glue: pad + stride-phase split (space-to-depth) + overlapping row tiles
    # TODO(synk): for the s=2 layers this phase split is an extra HBM round trip;
    # it could be fused into the previous layer's output store.
    xp = jnp.pad(x, ((0, 0), (p, s * Hq - H - p), (p, s * Wq - W - p), (0, 0)))
    xph = (xp.reshape(N, Hq, s, Wq, s, Cin)
             .transpose(0, 2, 4, 1, 3, 5)
             .reshape(N, P, Hq, Wq, Cin))
    hq_pad = T * tile_h + qk
    xph = jnp.pad(xph, ((0, n_pad - N), (0, 0), (0, hq_pad - Hq), (0, 0), (0, 0)))
    if T == 1:
        x_t = xph[:, None]                                   # [n_pad,1,P,Hq,Wq,Cin]
    else:
        rows = jnp.arange(T)[:, None] * tile_h + jnp.arange(tile_h + qk)[None, :]
        x_t = jnp.transpose(xph[:, :, rows], (0, 2, 1, 3, 4, 5))
    # x_t: [n_pad, T, P, tile_h + qk, Wq, Cin]

    scratch = [pltpu.VMEM((nb * tile_h * Wo, Cout), jnp.float32)]
    if g > 1:
        scratch.append(pltpu.VMEM((nb * tile_h * Wo, g * Cin), act_dtype))

    kernel = functools.partial(_conv_block_kernel, groups=tuple(groups),
                               tile_h=tile_h, out_w=Wo)
    out = pl.pallas_call(
        kernel,
        out_shape=jax.ShapeDtypeStruct((n_pad, T * tile_h, Wo, Cout), act_dtype),
        grid=(n_pad // nb, T),
        in_specs=[
            pl.BlockSpec((nb, 1, P, tile_h + qk, Wq, Cin),
                         lambda nbi, ti: (nbi, ti, 0, 0, 0, 0)),
            pl.BlockSpec((n_groups, g * Cin, Cout), lambda nbi, ti: (0, 0, 0)),
            pl.BlockSpec((1, Cout), lambda nbi, ti: (0, 0)),
        ],
        out_specs=pl.BlockSpec((nb, tile_h, Wo, Cout),
                               lambda nbi, ti: (nbi, ti, 0, 0)),
        scratch_shapes=scratch,
        compiler_params=pltpu.CompilerParams(
            dimension_semantics=("parallel", "parallel"),
            vmem_limit_bytes=vmem_limit,
        ),
    )(x_t, w_f, b2)
    return out[:N, :Ho]


def _im2col(x, k):
    """[N,H,W,C] -> [N,H,W,k*k*C]: k x k shifted copies (stride 1, pad k//2)."""
    N, H, W, C = x.shape
    p = k // 2
    xp = jnp.pad(x, ((0, 0), (p, p), (p, p), (0, 0)))
    cols = [xp[:, i:i + H, j:j + W, :] for i in range(k) for j in range(k)]
    return jnp.concatenate(cols, axis=-1)


def init_params(key, channels=1):
    """Deterministic synthetic parameters (shapes per the module __init__)."""
    params = []
    in_c = channels
    for i in range(7):
        out_c, k = DIMS[i], KERNELS[i]
        key, kw, kb = jax.random.split(key, 3)
        fan_in = in_c * k * k
        w = jax.random.normal(kw, (k, k, in_c, out_c), jnp.float32) / np.sqrt(fan_in)
        b = 0.01 * jax.random.normal(kb, (out_c,), jnp.float32)
        params.append((w, b))
        in_c = out_c
    return params


def content_encoder_forward(x_nchw, params, act_dtype=jnp.float32):
    """Matches ContentEncoder.forward: returns [X, out_0, ..., out_6] (all NCHW)."""
    outs = [x_nchw]
    x = jnp.transpose(x_nchw, (0, 2, 3, 1))          # NCHW -> NHWC for the kernels
    for i in range(7):
        w, b = params[i]
        k, s = KERNELS[i], STRIDES[i]
        if i == 0 and s == 1:
            # Layer 0 has a tiny Cin: wrapper-side im2col turns the kxk conv into
            # a 1x1 conv with K = k*k*Cin so the kernel issues one well-shaped
            # matmul per tile instead of k*k rank-Cin products.
            x_in = _im2col(x, k)
            w_in = w.reshape(1, 1, k * k * w.shape[2], w.shape[3])
            k_in, s_in = 1, 1
        else:
            x_in, w_in, k_in, s_in = x, w, k, s
        x = encoder_block(x_in, w_in, b, k_in, s_in, act_dtype=act_dtype)
        outs.append(jnp.transpose(x, (0, 3, 1, 2)))  # back to NCHW
    return outs


def reference_forward(x_nchw, params):
    """Pure-JAX reference (lax.conv) with identical semantics, for verification."""
    outs = [x_nchw]
    x = jnp.transpose(x_nchw, (0, 2, 3, 1))
    for i in range(7):
        w, b = params[i]
        k, s = KERNELS[i], STRIDES[i]
        p = k // 2
        y = lax.conv_general_dilated(
            x, w, (s, s), [(p, p), (p, p)],
            dimension_numbers=('NHWC', 'HWIO', 'NHWC'))
        y = y + b
        y = jnp.where(y >= 0, y, NEG_SLOPE * y)
        x = y
        outs.append(jnp.transpose(x, (0, 3, 1, 2)))
    return outs


if __name__ == "__main__":
    key = jax.random.PRNGKey(0)
    kx, kx2, kp = jax.random.split(key, 3)
    params = init_params(kp, channels=1)

    # --- small shape consistent with the module (batch=2, channels=1, 16x16) ---
    x = jax.random.normal(kx, (2, 1, 16, 16), jnp.float32)
    refs = reference_forward(x, params)
    outs = jax.block_until_ready(content_encoder_forward(x, params, jnp.float32))
    assert len(outs) == 8
    for o, r in zip(outs, refs):
        assert o.shape == r.shape
        np.testing.assert_allclose(np.asarray(o, np.float32),
                                   np.asarray(r, np.float32),
                                   rtol=1e-2, atol=1e-2)

    # --- larger spatial size: exercises the row-tiled path + bf16 activations ---
    x2 = jax.random.normal(kx2, (2, 1, 64, 64), jnp.float32)
    refs2 = reference_forward(x2, params)
    outs2 = jax.block_until_ready(
        content_encoder_forward(x2, params, jnp.bfloat16))
    for o, r in zip(outs2[1:], refs2[1:]):
        assert o.shape == r.shape
        np.testing.assert_allclose(np.asarray(o.astype(jnp.float32)),
                                   np.asarray(r, np.float32),
                                   rtol=0.1, atol=0.1)

    print("KERNEL_OK")
</pallas_src>

<mosaic_0001>
module attributes {stable_mosaic.version = 11 : i64} {
  func.func @_conv_block_kernel(%arg0: i32, %arg1: i32, %arg2: memref<2x1x1x16x16x25xf32, #tpu.memory_space<vmem>>, %arg3: memref<1x25x64xf32, #tpu.memory_space<vmem>>, %arg4: memref<1x64xf32, #tpu.memory_space<vmem>>, %arg5: memref<2x16x16x64xf32, #tpu.memory_space<vmem>>, %arg6: memref<512x64xf32, #tpu.memory_space<vmem>>) attributes {dimension_semantics = [#tpu.dimension_semantics<parallel>, #tpu.dimension_semantics<parallel>], iteration_bounds = array<i64: 1, 1>, scalar_prefetch = 0 : i64, scratch_operands = 1 : i64, tpu.core_type = #tpu.core_type<tc>, window_params = [{transform_indices = @transform_0, window_bounds = array<i64: 2, 1, 1, 16, 16, 25>}, {pipeline_mode = #tpu.pipeline_mode<synchronous>, transform_indices = @transform_1, window_bounds = array<i64: 1, 25, 64>}, {pipeline_mode = #tpu.pipeline_mode<synchronous>, transform_indices = @transform_2, window_bounds = array<i64: 1, 64>}, {transform_indices = @transform_3, window_bounds = array<i64: 2, 16, 16, 64>}]} {
    %c0 = arith.constant 0 : index
    %c0_0 = arith.constant 0 : index
    %c0_1 = arith.constant 0 : index
    %c0_2 = arith.constant 0 : index
    %c0_3 = arith.constant 0 : index
    %c0_4 = arith.constant 0 : index
    %0 = vector.load %arg2[%c0, %c0_0, %c0_1, %c0_2, %c0_3, %c0_4] : memref<2x1x1x16x16x25xf32, #tpu.memory_space<vmem>>, vector<2x1x1x16x16x25xf32>
    %1 = vector.shape_cast %0 : vector<2x1x1x16x16x25xf32> to vector<2x16x16x25xf32>
    %2 = vector.shape_cast %1 : vector<2x16x16x25xf32> to vector<512x25xf32>
    %c0_5 = arith.constant 0 : index
    %c0_6 = arith.constant 0 : index
    %c0_7 = arith.constant 0 : index
    %3 = vector.load %arg3[%c0_5, %c0_6, %c0_7] : memref<1x25x64xf32, #tpu.memory_space<vmem>>, vector<1x25x64xf32>
    %4 = vector.shape_cast %3 : vector<1x25x64xf32> to vector<25x64xf32>
    %cst = arith.constant dense<0.000000e+00> : vector<512x64xf32>
    %5 = tpu.matmul %2, %4, %cst {dimension_numbers = #tpu.dot_dimension_numbers<[1], [0], [0], [1], [0, 0, 1, 1], [], []>} : vector<512x25xf32>, vector<25x64xf32>, vector<512x64xf32> -> vector<512x64xf32>
    %c0_8 = arith.constant 0 : index
    %c0_9 = arith.constant 0 : index
    %6 = vector.load %arg6[%c0_8, %c0_9] : memref<512x64xf32, #tpu.memory_space<vmem>>, vector<512x64xf32>
    tpu.vector_store %arg6[%c0_8, %c0_9], %5 {strides = array<i32>} : memref<512x64xf32, #tpu.memory_space<vmem>>, vector<512x64xf32>,
    %c0_10 = arith.constant 0 : index
    %c0_11 = arith.constant 0 : index
    %7 = vector.load %arg6[%c0_10, %c0_11] : memref<512x64xf32, #tpu.memory_space<vmem>>, vector<512x64xf32>
    %c0_12 = arith.constant 0 : index
    %c0_13 = arith.constant 0 : index
    %8 = vector.load %arg4[%c0_12, %c0_13] : memref<1x64xf32, #tpu.memory_space<vmem>>, vector<1x64xf32>
    %9 = vector.broadcast %8 : vector<1x64xf32> to vector<512x64xf32>
    %10 = arith.addf %7, %9 : vector<512x64xf32>
    %cst_14 = arith.constant 0.000000e+00 : f32
    %11 = vector.broadcast %cst_14 : f32 to vector<512x64xf32>
    %12 = arith.cmpf oge, %10, %11 : vector<512x64xf32>
    %cst_15 = arith.constant 2.000000e-01 : f32
    %13 = vector.broadcast %cst_15 : f32 to vector<512x64xf32>
    %14 = arith.mulf %13, %10 : vector<512x64xf32>
    %15 = arith.select %12, %10, %14 : vector<512x64xi1>, vector<512x64xf32>
    %16 = vector.shape_cast %15 : vector<512x64xf32> to vector<2x16x16x64xf32>
    %c0_16 = arith.constant 0 : index
    %c0_17 = arith.constant 0 : index
    %c0_18 = arith.constant 0 : index
    %c0_19 = arith.constant 0 : index
    %17 = vector.load %arg5[%c0_16, %c0_17, %c0_18, %c0_19] : memref<2x16x16x64xf32, #tpu.memory_space<vmem>>, vector<2x16x16x64xf32>
    tpu.vector_store %arg5[%c0_16, %c0_17, %c0_18, %c0_19], %16 {strides = array<i32>} : memref<2x16x16x64xf32, #tpu.memory_space<vmem>>, vector<2x16x16x64xf32>,
    return
  }
  func.func @transform_0(%arg0: i32, %arg1: i32) -> (i32, i32, i32, i32, i32, i32) {
    %c0_i32 = arith.constant 0 : i32
    %c0_i32_0 = arith.constant 0 : i32
    %c0_i32_1 = arith.constant 0 : i32
    %c0_i32_2 = arith.constant 0 : i32
    %c0_i32_3 = arith.constant 0 : i32
    return %arg0, %arg1, %c0_i32, %c0_i32_0, %c0_i32_1, %c0_i32_2 : i32, i32, i32, i32, i32, i32
  }
  func.func @transform_1(%arg0: i32, %arg1: i32) -> (i32, i32, i32) {
    %c0_i32 = arith.constant 0 : i32
    %c0_i32_0 = arith.constant 0 : i32
    %c0_i32_1 = arith.constant 0 : i32
    %c0_i32_2 = arith.constant 0 : i32
    return %c0_i32, %c0_i32_0, %c0_i32_1 : i32, i32, i32
  }
  func.func @transform_2(%arg0: i32, %arg1: i32) -> (i32, i32) {
    %c0_i32 = arith.constant 0 : i32
    %c0_i32_0 = arith.constant 0 : i32
    %c0_i32_1 = arith.constant 0 : i32
    return %c0_i32, %c0_i32_0 : i32, i32
  }
  func.func @transform_3(%arg0: i32, %arg1: i32) -> (i32, i32, i32, i32) {
    %c0_i32 = arith.constant 0 : i32
    %c0_i32_0 = arith.constant 0 : i32
    %c0_i32_1 = arith.constant 0 : i32
    return %arg0, %arg1, %c0_i32, %c0_i32_0 : i32, i32, i32, i32
  }
}

</mosaic_0001>

<bundles_post_ra>
// kernel: tpu_custom_call.1
= control target key start
LH: loop header
LB: loop body
LE: loop exit
PB: predicated region body
PF: predicated region fallthrough
CT: control target
= control target key end

     0   :  { %8 = vsyncpa [#allocation4], 0  ;;  %s1420_s0 = inlined_call_operand.hbm [shape: f32[2,1,1,16,16,25], index: 0, kind: input, shape index: {}]   ;;  %s1421_s1 = inlined_call_operand.vmem [shape: f32[1,25,64], index: 1, kind: input, shape index: {}]   ;;  %s1422_s2 = inlined_call_operand.vmem [shape: f32[1,64], index: 2, kind: input, shape index: {}]   ;;  %s1423_s3 = inlined_call_operand.hbm [shape: f32[2,16,16,64], index: 3, kind: output, shape index: {}]  }
   0x1   :  { %9 = vsyncpa [#allocation5], 0  ;;  %s14_s14 = sshll.u32 %s1420_s0, 4  ;;  %s1111_s15 = smov [#allocation3]   ;;  %s15_s14 = int_to_ptr.hbm [resolvable:$true] %s14_s14 }
   0x2   :  { %s16_s16 = sshll.u32 %s1111_s15, 4  ;;  %s1112_s17 = smov 128   ;;  %s17_s16 = int_to_ptr.vmem [resolvable:$true] %s16_s16 }
   0x3   :  { %s1113_s18 = smov 8  }
   0x4   :  { %22 = dma.hbm_to_vmem [thread:$0]  %s15_s14, 8192, %s17_s16, [#allocation4], %s1112_s17, %s1112_s17, %s1113_s18  }
   0x5   :  { %1107 = dma.done.wait [#allocation4], 8192  }
   0x6   :  { %1108 = vsyncadd [#allocation4], 4294959104  ;;  %vm292_vm0 = vcmask 1040384   ;;  %v98_v0 = vld [vmem:[%s1421_s1 + $0x18] sm:$0x1]  ;;  %v97_v1 = vld [vmem:[%s1421_s1 + $0x10] sm:$0xff] }
   0x7   :  { %1043 = vmatpush.msk.msra.mxu2 %vm292_vm0, %v98_v0  ;;  %1044 = vmatpush.msk.msra.mxu3 %vm292_vm0, %v98_v0  ;;  %v96_v2 = vld [vmem:[%s1421_s1 + $0x8] sm:$0xff]  ;;  %v95_v3 = vld [vmem:[%s1421_s1] sm:$0xff]  ;;  %vm99_vm1 = vcmask 203776   ;;  %v65_v12 = vld [vmem:[#allocation3 + $0x110] sm:$0xff]  ;;  %vm505_vm2 = vcmask 523264   ;;  %s964_s30 = sshll.u32 %s1423_s3, 4  ;;  %s965_s30 = int_to_ptr.hbm [resolvable:$true] %s964_s30 }
   0x8   :  { %977 = vmatpush.msk.msra.mxu0 %vm292_vm0, %v98_v0  ;;  %1042 = vmatpush.msk.msra.mxu1 %vm292_vm0, %v98_v0  ;;  %v63_v4 = vld [vmem:[#allocation3 + $0x100] sm:$0xff]  ;;  %v64_v8 = vld [vmem:[#allocation3 + $0x108] sm:$0xff]  ;;  %v81_v13 = vld [vmem:[#allocation3 + $0x190] sm:$0xff] }
   0x9   :  { %1046 = vmatpush.msra.mxu2 %v97_v1  ;;  %1047 = vmatpush.msra.mxu3 %v97_v1  ;;  %v79_v5 = vld [vmem:[#allocation3 + $0x180] sm:$0xff]  ;;  %v80_v9 = vld [vmem:[#allocation3 + $0x188] sm:$0xff]  ;;  %v33_v14 = vld [vmem:[#allocation3 + $0x10] sm:$0xff] }
   0xa   :  { %309 = vmatpush.msra.mxu0 %v97_v1  ;;  %1045 = vmatpush.msra.mxu1 %v97_v1  ;;  %v31_v6 = vld [vmem:[#allocation3] sm:$0xff]  ;;  %v32_v10 = vld [vmem:[#allocation3 + $0x8] sm:$0xff]  ;;  %v49_v15 = vld [vmem:[#allocation3 + $0x90] sm:$0xff] }
   0xb   :  { %1049 = vmatpush.msra.mxu2 %v96_v2  ;;  %1050 = vmatpush.msra.mxu3 %v96_v2  ;;  %v47_v7 = vld [vmem:[#allocation3 + $0x80] sm:$0xff]  ;;  %v48_v11 = vld [vmem:[#allocation3 + $0x88] sm:$0xff]  ;;  %v66_v16 = vld [vmem:[#allocation3 + $0x118] sm:$0xff] }
   0xc   :  { %310 = vmatpush.msra.mxu0 %v96_v2  ;;  %1048 = vmatpush.msra.mxu1 %v96_v2  ;;  %v82_v17 = vld [vmem:[#allocation3 + $0x198] sm:$0xff]  ;;  %v67_v20 = vld [vmem:[#allocation3 + $0x120] sm:$0xff]  ;;  %v68_v24 = vld [vmem:[#allocation3 + $0x128] sm:$0xff] }
   0xd   :  { %1052 = vmatpush.msra.mxu2 %v95_v3  ;;  %1053 = vmatpush.msra.mxu3 %v95_v3  ;;  %v34_v18 = vld [vmem:[#allocation3 + $0x18] sm:$0xff]  ;;  %v83_v21 = vld [vmem:[#allocation3 + $0x1a0] sm:$0xff]  ;;  %v84_v25 = vld [vmem:[#allocation3 + $0x1a8] sm:$0xff] }
   0xe   :  { %1010 = vmatmul.msk.f32.vlgmr.msra.gmra.mxu2 %vm99_vm1, %v63_v4  ;;  %1026 = vmatmul.msk.f32.vlgmr.msra.gmra.mxu3 %vm99_vm1, %v79_v5  ;;  %v50_v19 = vld [vmem:[#allocation3 + $0x98] sm:$0xff]  ;;  %v35_v22 = vld [vmem:[#allocation3 + $0x20] sm:$0xff]  ;;  %v36_v26 = vld [vmem:[#allocation3 + $0x28] sm:$0xff] }
   0xf   :  { %311 = vmatpush.msra.mxu0 %v95_v3  ;;  %1051 = vmatpush.msra.mxu1 %v95_v3  ;;  %v51_v23 = vld [vmem:[#allocation3 + $0xa0] sm:$0xff]  ;;  %v52_v27 = vld [vmem:[#allocation3 + $0xa8] sm:$0xff]  ;;  %v69_v28 = vld [vmem:[#allocation3 + $0x130] sm:$0xff] }
  0x10   :  { %978 = vmatmul.msk.f32.vlgmr.msra.gmra.mxu0 %vm99_vm1, %v31_v6  ;;  %994 = vmatmul.msk.f32.vlgmr.msra.gmra.mxu1 %vm99_vm1, %v47_v7  ;;  %v85_v29 = vld [vmem:[#allocation3 + $0x1b0] sm:$0xff]  ;;  %v70_v32 = vld [vmem:[#allocation3 + $0x138] sm:$0xff]  ;;  %v71_v36 = vld [vmem:[#allocation3 + $0x140] sm:$0xff] }
  0x11   :  { %v37_v30 = vld [vmem:[#allocation3 + $0x30] sm:$0xff]  ;;  %v86_v33 = vld [vmem:[#allocation3 + $0x1b8] sm:$0xff]  ;;  %v87_v37 = vld [vmem:[#allocation3 + $0x1c0] sm:$0xff] }
  0x12   :  { %v53_v31 = vld [vmem:[#allocation3 + $0xb0] sm:$0xff]  ;;  %v38_v34 = vld [vmem:[#allocation3 + $0x38] sm:$0xff]  ;;  %v39_v38 = vld [vmem:[#allocation3 + $0x40] sm:$0xff] }
  0x13   :  { %v54_v35 = vld [vmem:[#allocation3 + $0xb8] sm:$0xff]  ;;  %v55_v39 = vld [vmem:[#allocation3 + $0xc0] sm:$0xff]  ;;  %v72_v40 = vld [vmem:[#allocation3 + $0x148] sm:$0xff] }
  0x14   :  { %v88_v41 = vld [vmem:[#allocation3 + $0x1c8] sm:$0xff]  ;;  %v73_v44 = vld [vmem:[#allocation3 + $0x150] sm:$0xff]  ;;  %v74_v48 = vld [vmem:[#allocation3 + $0x158] sm:$0xff] }
  0x15   :  { %v40_v42 = vld [vmem:[#allocation3 + $0x48] sm:$0xff]  ;;  %v89_v45 = vld [vmem:[#allocation3 + $0x1d0] sm:$0xff]  ;;  %v90_v49 = vld [vmem:[#allocation3 + $0x1d8] sm:$0xff] }
  0x16   :  { %1011 = vmatmul.msk.f32.gmra.mxu2 %vm99_vm1, %v64_v8  ;;  %1027 = vmatmul.msk.f32.gmra.mxu3 %vm99_vm1, %v80_v9  ;;  %v56_v43 = vld [vmem:[#allocation3 + $0xc8] sm:$0xff]  ;;  %v41_v46 = vld [vmem:[#allocation3 + $0x50] sm:$0xff]  ;;  %v42_v50 = vld [vmem:[#allocation3 + $0x58] sm:$0xff] }
  0x17   :  { %v57_v47 = vld [vmem:[#allocation3 + $0xd0] sm:$0xff]  ;;  %v58_v51 = vld [vmem:[#allocation3 + $0xd8] sm:$0xff]  ;;  %v75_v52 = vld [vmem:[#allocation3 + $0x160] sm:$0xff] }
  0x18   :  { %979 = vmatmul.msk.f32.gmra.mxu0 %vm99_vm1, %v32_v10  ;;  %995 = vmatmul.msk.f32.gmra.mxu1 %vm99_vm1, %v48_v11  ;;  %v91_v53 = vld [vmem:[#allocation3 + $0x1e0] sm:$0xff]  ;;  %v76_v56 = vld [vmem:[#allocation3 + $0x168] sm:$0xff]  ;;  %v77_v60 = vld [vmem:[#allocation3 + $0x170] sm:$0xff] }
  0x19   :  { %v43_v54 = vld [vmem:[#allocation3 + $0x60] sm:$0xff]  ;;  %v92_v57 = vld [vmem:[#allocation3 + $0x1e8] sm:$0xff]  ;;  %v93_v61 = vld [vmem:[#allocation3 + $0x1f0] sm:$0xff] }
  0x1a   :  { %v59_v55 = vld [vmem:[#allocation3 + $0xe0] sm:$0xff]  ;;  %v44_v58 = vld [vmem:[#allocation3 + $0x68] sm:$0xff]  ;;  %v45_v62 = vld [vmem:[#allocation3 + $0x70] sm:$0xff] }
  0x1b   :  { %v60_v59 = vld [vmem:[#allocation3 + $0xe8] sm:$0xff]  ;;  %v61_v63 = vld [vmem:[#allocation3 + $0xf0] sm:$0xff]  ;;  %v78_v0 = vld [vmem:[#allocation3 + $0x178] sm:$0xff] }
  0x1c   :  { %v94_v1 = vld [vmem:[#allocation3 + $0x1f8] sm:$0xff]  ;;  %v1222_v8 = vld [vmem:[%s1422_s2] ss:$0 sm:$0xff]  ;;  %s1114_s2 = smov [#allocation6]  }
  0x1d   :  { %v46_v2 = vld [vmem:[#allocation3 + $0x78] sm:$0xff]  ;;  %s962_s27 = sshll.u32 %s1114_s2, 4  ;;  %s963_s27 = int_to_ptr.vmem [resolvable:$true] %s962_s27 }
  0x1e   :  { %1012 = vmatmul.msk.f32.gmra.mxu2 %vm99_vm1, %v65_v12  ;;  %1028 = vmatmul.msk.f32.gmra.mxu3 %vm99_vm1, %v81_v13  ;;  %v62_v3 = vld [vmem:[#allocation3 + $0xf8] sm:$0xff] }
  0x20   :  { %980 = vmatmul.msk.f32.gmra.mxu0 %vm99_vm1, %v33_v14  ;;  %996 = vmatmul.msk.f32.gmra.mxu1 %vm99_vm1, %v49_v15 }
  0x26   :  { %1013 = vmatmul.msk.f32.gmra.mxu2 %vm99_vm1, %v66_v16  ;;  %1029 = vmatmul.msk.f32.gmra.mxu3 %vm99_vm1, %v82_v17 }
  0x28   :  { %981 = vmatmul.msk.f32.gmra.mxu0 %vm99_vm1, %v34_v18  ;;  %997 = vmatmul.msk.f32.gmra.mxu1 %vm99_vm1, %v50_v19 }
  0x2e   :  { %1014 = vmatmul.msk.f32.gmra.mxu2 %vm99_vm1, %v67_v20  ;;  %1030 = vmatmul.msk.f32.gmra.mxu3 %vm99_vm1, %v83_v21 }
  0x30   :  { %982 = vmatmul.msk.f32.gmra.mxu0 %vm99_vm1, %v35_v22  ;;  %998 = vmatmul.msk.f32.gmra.mxu1 %vm99_vm1, %v51_v23 }
  0x36   :  { %1015 = vmatmul.msk.f32.gmra.mxu2 %vm99_vm1, %v68_v24  ;;  %1031 = vmatmul.msk.f32.gmra.mxu3 %vm99_vm1, %v84_v25 }
  0x38   :  { %983 = vmatmul.msk.f32.gmra.mxu0 %vm99_vm1, %v36_v26  ;;  %999 = vmatmul.msk.f32.gmra.mxu1 %vm99_vm1, %v52_v27 }
  0x3e   :  { %1016 = vmatmul.msk.f32.gmra.mxu2 %vm99_vm1, %v69_v28  ;;  %1032 = vmatmul.msk.f32.gmra.mxu3 %vm99_vm1, %v85_v29 }
  0x40   :  { %984 = vmatmul.msk.f32.gmra.mxu0 %vm99_vm1, %v37_v30  ;;  %1000 = vmatmul.msk.f32.gmra.mxu1 %vm99_vm1, %v53_v31 }
  0x46   :  { %1017 = vmatmul.msk.f32.gmra.mxu2 %vm99_vm1, %v70_v32  ;;  %1033 = vmatmul.msk.f32.gmra.mxu3 %vm99_vm1, %v86_v33 }
  0x48   :  { %985 = vmatmul.msk.f32.gmra.mxu0 %vm99_vm1, %v38_v34  ;;  %1001 = vmatmul.msk.f32.gmra.mxu1 %vm99_vm1, %v54_v35 }
  0x4e   :  { %1018 = vmatmul.msk.f32.gmra.mxu2 %vm99_vm1, %v71_v36  ;;  %1034 = vmatmul.msk.f32.gmra.mxu3 %vm99_vm1, %v87_v37 }
  0x50   :  { %986 = vmatmul.msk.f32.gmra.mxu0 %vm99_vm1, %v39_v38  ;;  %1002 = vmatmul.msk.f32.gmra.mxu1 %vm99_vm1, %v55_v39 }
  0x56   :  { %1019 = vmatmul.msk.f32.gmra.mxu2 %vm99_vm1, %v72_v40  ;;  %1035 = vmatmul.msk.f32.gmra.mxu3 %vm99_vm1, %v88_v41 }
  0x58   :  { %987 = vmatmul.msk.f32.gmra.mxu0 %vm99_vm1, %v40_v42  ;;  %1003 = vmatmul.msk.f32.gmra.mxu1 %vm99_vm1, %v56_v43 }
  0x5e   :  { %1020 = vmatmul.msk.f32.gmra.mxu2 %vm99_vm1, %v73_v44  ;;  %1036 = vmatmul.msk.f32.gmra.mxu3 %vm99_vm1, %v89_v45 }
  0x60   :  { %988 = vmatmul.msk.f32.gmra.mxu0 %vm99_vm1, %v41_v46  ;;  %1004 = vmatmul.msk.f32.gmra.mxu1 %vm99_vm1, %v57_v47 }
  0x66   :  { %1021 = vmatmul.msk.f32.gmra.mxu2 %vm99_vm1, %v74_v48  ;;  %1037 = vmatmul.msk.f32.gmra.mxu3 %vm99_vm1, %v90_v49 }
  0x68   :  { %989 = vmatmul.msk.f32.gmra.mxu0 %vm99_vm1, %v42_v50  ;;  %1005 = vmatmul.msk.f32.gmra.mxu1 %vm99_vm1, %v58_v51 }
  0x6e   :  { %1022 = vmatmul.msk.f32.gmra.mxu2 %vm99_vm1, %v75_v52  ;;  %1038 = vmatmul.msk.f32.gmra.mxu3 %vm99_vm1, %v91_v53 }
  0x70   :  { %990 = vmatmul.msk.f32.gmra.mxu0 %vm99_vm1, %v43_v54  ;;  %1006 = vmatmul.msk.f32.gmra.mxu1 %vm99_vm1, %v59_v55 }
  0x76   :  { %1023 = vmatmul.msk.f32.gmra.mxu2 %vm99_vm1, %v76_v56  ;;  %1039 = vmatmul.msk.f32.gmra.mxu3 %vm99_vm1, %v92_v57 }
  0x78   :  { %991 = vmatmul.msk.f32.gmra.mxu0 %vm99_vm1, %v44_v58  ;;  %1007 = vmatmul.msk.f32.gmra.mxu1 %vm99_vm1, %v60_v59 }
  0x7e   :  { %1024 = vmatmul.msk.f32.gmra.mxu2 %vm99_vm1, %v77_v60  ;;  %1040 = vmatmul.msk.f32.gmra.mxu3 %vm99_vm1, %v93_v61 }
  0x80   :  { %992 = vmatmul.msk.f32.gmra.mxu0 %vm99_vm1, %v45_v62  ;;  %1008 = vmatmul.msk.f32.gmra.mxu1 %vm99_vm1, %v61_v63 }
  0x86   :  { %1025 = vmatmul.msk.f32.gmra.mxu2 %vm99_vm1, %v78_v0  ;;  %1041 = vmatmul.msk.f32.gmra.mxu3 %vm99_vm1, %v94_v1 }
  0x88   :  { %993 = vmatmul.msk.f32.gmra.mxu0 %vm99_vm1, %v46_v2  ;;  %1009 = vmatmul.msk.f32.gmra.mxu1 %vm99_vm1, %v62_v3 }
  0x8d   :  { %v313_v4 = vpop.f32.mrf.mxu0  ;;  %v361_v5 = vpop.f32.mrf.mxu1 }
  0x8e   :  { %506 = vst.msk [vmem:[#allocation2] sm:$0xff] %vm505_vm2, %v313_v4 }
  0x8f   :  { %522 = vst.msk [vmem:[#allocation2 + $0x80] sm:$0xff] %vm505_vm2, %v361_v5 }
  0x91   :  { %v409_v6 = vpop.f32.mrf.mxu2  ;;  %v457_v7 = vpop.f32.mrf.mxu3 }
  0x92   :  { %538 = vst.msk [vmem:[#allocation2 + $0x100] sm:$0xff] %vm505_vm2, %v409_v6 }
  0x93   :  { %554 = vst.msk [vmem:[#allocation2 + $0x180] sm:$0xff] %vm505_vm2, %v457_v7 }
  0x95   :  { %v570_v9 = vld [vmem:[#allocation2] sm:$0xff]  ;;  %v316_v10 = vpop.f32.mrf.mxu0  ;;  %v364_v11 = vpop.f32.mrf.mxu1 }
  0x96   :  { %v638_v12 = vadd.f32 %v1222_v8, %v570_v9  ;;  %v586_v13 = vld [vmem:[#allocation2 + $0x80] sm:$0xff]  ;;  %507 = vst.msk [vmem:[#allocation2 + $0x8] sm:$0xff] %vm505_vm2, %v316_v10 }
  0x97   :  { %v654_v14 = vadd.f32 %v1222_v8, %v586_v13  ;;  %523 = vst.msk [vmem:[#allocation2 + $0x88] sm:$0xff] %vm505_vm2, %v364_v11 }
  0x98   :  { %vm702_vm3 = vcmp.ge.f32.partialorder %v638_v12, 0.0  ;;  %v766_v15 = vmul.f32 0.2, %v638_v12 }
  0x99   :  { %vm718_vm4 = vcmp.ge.f32.partialorder %v654_v14, 0.0  ;;  %v782_v16 = vmul.f32 0.2, %v654_v14  ;;  %v602_v17 = vld [vmem:[#allocation2 + $0x100] sm:$0xff]  ;;  %v412_v18 = vpop.f32.mrf.mxu2  ;;  %v460_v19 = vpop.f32.mrf.mxu3 }
  0x9a   :  { %v830_v20 = vsel %vm702_vm3, %v638_v12, %v766_v15  ;;  %v670_v21 = vadd.f32 %v1222_v8, %v602_v17  ;;  %v618_v22 = vld [vmem:[#allocation2 + $0x180] sm:$0xff]  ;;  %539 = vst.msk [vmem:[#allocation2 + $0x108] sm:$0xff] %vm505_vm2, %v412_v18 }
  0x9b   :  { %894 = vst.msk [vmem:[#allocation6] sm:$0xff] %vm505_vm2, %v830_v20  ;;  %v846_v23 = vsel %vm718_vm4, %v654_v14, %v782_v16  ;;  %v686_v24 = vadd.f32 %v1222_v8, %v618_v22 }
  0x9c   :  { %910 = vst.msk [vmem:[#allocation6 + $0x80] sm:$0xff] %vm505_vm2, %v846_v23  ;;  %vm734_vm5 = vcmp.ge.f32.partialorder %v670_v21, 0.0  ;;  %v798_v25 = vmul.f32 0.2, %v670_v21 }
  0x9d   :  { %vm750_vm6 = vcmp.ge.f32.partialorder %v686_v24, 0.0  ;;  %v814_v26 = vmul.f32 0.2, %v686_v24  ;;  %v571_v27 = vld [vmem:[#allocation2 + $0x8] sm:$0xff]  ;;  %555 = vst.msk [vmem:[#allocation2 + $0x188] sm:$0xff] %vm505_vm2, %v460_v19  ;;  %v319_v28 = vpop.f32.mrf.mxu0  ;;  %v367_v29 = vpop.f32.mrf.mxu1 }
  0x9e   :  { %v862_v30 = vsel %vm734_vm5, %v670_v21, %v798_v25  ;;  %v639_v31 = vadd.f32 %v1222_v8, %v571_v27  ;;  %v587_v32 = vld [vmem:[#allocation2 + $0x88] sm:$0xff]  ;;  %508 = vst.msk [vmem:[#allocation2 + $0x10] sm:$0xff] %vm505_vm2, %v319_v28 }
  0x9f   :  { %926 = vst.msk [vmem:[#allocation6 + $0x100] sm:$0xff] %vm505_vm2, %v862_v30  ;;  %v878_v33 = vsel %vm750_vm6, %v686_v24, %v814_v26  ;;  %v655_v34 = vadd.f32 %v1222_v8, %v587_v32 }
  0xa0   :  { %942 = vst.msk [vmem:[#allocation6 + $0x180] sm:$0xff] %vm505_vm2, %v878_v33  ;;  %vm703_vm7 = vcmp.ge.f32.partialorder %v639_v31, 0.0  ;;  %v767_v35 = vmul.f32 0.2, %v639_v31 }
  0xa1   :  { %vm719_vm8 = vcmp.ge.f32.partialorder %v655_v34, 0.0  ;;  %v783_v36 = vmul.f32 0.2, %v655_v34  ;;  %v603_v37 = vld [vmem:[#allocation2 + $0x108] sm:$0xff]  ;;  %524 = vst.msk [vmem:[#allocation2 + $0x90] sm:$0xff] %vm505_vm2, %v367_v29  ;;  %v415_v38 = vpop.f32.mrf.mxu2  ;;  %v463_v39 = vpop.f32.mrf.mxu3 }
  0xa2   :  { %v831_v40 = vsel %vm703_vm7, %v639_v31, %v767_v35  ;;  %v671_v41 = vadd.f32 %v1222_v8, %v603_v37  ;;  %540 = vst.msk [vmem:[#allocation2 + $0x110] sm:$0xff] %vm505_vm2, %v415_v38 }
  0xa3   :  { %895 = vst.msk [vmem:[#allocation6 + $0x8] sm:$0xff] %vm505_vm2, %v831_v40  ;;  %v847_v42 = vsel %vm719_vm8, %v655_v34, %v783_v36 }
  0xa4   :  { %911 = vst.msk [vmem:[#allocation6 + $0x88] sm:$0xff] %vm505_vm2, %v847_v42  ;;  %vm735_vm9 = vcmp.ge.f32.partialorder %v671_v41, 0.0  ;;  %v799_v43 = vmul.f32 0.2, %v671_v41  ;;  %v619_v44 = vld [vmem:[#allocation2 + $0x188] sm:$0xff] }
  0xa5   :  { %v687_v45 = vadd.f32 %v1222_v8, %v619_v44  ;;  %v572_v46 = vld [vmem:[#allocation2 + $0x10] sm:$0xff]  ;;  %556 = vst.msk [vmem:[#allocation2 + $0x190] sm:$0xff] %vm505_vm2, %v463_v39  ;;  %v322_v47 = vpop.f32.mrf.mxu0  ;;  %v370_v48 = vpop.f32.mrf.mxu1 }
  0xa6   :  { %v863_v49 = vsel %vm735_vm9, %v671_v41, %v799_v43  ;;  %v640_v50 = vadd.f32 %v1222_v8, %v572_v46  ;;  %509 = vst.msk [vmem:[#allocation2 + $0x18] sm:$0xff] %vm505_vm2, %v322_v47 }
  0xa7   :  { %927 = vst.msk [vmem:[#allocation6 + $0x108] sm:$0xff] %vm505_vm2, %v863_v49  ;;  %vm751_vm10 = vcmp.ge.f32.partialorder %v687_v45, 0.0  ;;  %v815_v51 = vmul.f32 0.2, %v687_v45 }
  0xa8   :  { %vm704_vm11 = vcmp.ge.f32.partialorder %v640_v50, 0.0  ;;  %v768_v52 = vmul.f32 0.2, %v640_v50  ;;  %v588_v53 = vld [vmem:[#allocation2 + $0x90] sm:$0xff]  ;;  %525 = vst.msk [vmem:[#allocation2 + $0x98] sm:$0xff] %vm505_vm2, %v370_v48 }
  0xa9   :  { %v879_v54 = vsel %vm751_vm10, %v687_v45, %v815_v51  ;;  %v656_v55 = vadd.f32 %v1222_v8, %v588_v53  ;;  %v604_v56 = vld [vmem:[#allocation2 + $0x110] sm:$0xff]  ;;  %v418_v57 = vpop.f32.mrf.mxu2  ;;  %v466_v58 = vpop.f32.mrf.mxu3 }
  0xaa   :  { %943 = vst.msk [vmem:[#allocation6 + $0x188] sm:$0xff] %vm505_vm2, %v879_v54  ;;  %v832_v59 = vsel %vm704_vm11, %v640_v50, %v768_v52  ;;  %v672_v60 = vadd.f32 %v1222_v8, %v604_v56 }
  0xab   :  { %896 = vst.msk [vmem:[#allocation6 + $0x10] sm:$0xff] %vm505_vm2, %v832_v59  ;;  %vm720_vm12 = vcmp.ge.f32.partialorder %v656_v55, 0.0  ;;  %v784_v61 = vmul.f32 0.2, %v656_v55 }
  0xac   :  { %vm736_vm13 = vcmp.ge.f32.partialorder %v672_v60, 0.0  ;;  %v800_v62 = vmul.f32 0.2, %v672_v60  ;;  %v620_v63 = vld [vmem:[#allocation2 + $0x190] sm:$0xff]  ;;  %541 = vst.msk [vmem:[#allocation2 + $0x118] sm:$0xff] %vm505_vm2, %v418_v57 }
  0xad   :  { %v848_v0 = vsel %vm720_vm12, %v656_v55, %v784_v61  ;;  %v688_v1 = vadd.f32 %v1222_v8, %v620_v63  ;;  %v573_v2 = vld [vmem:[#allocation2 + $0x18] sm:$0xff]  ;;  %557 = vst.msk [vmem:[#allocation2 + $0x198] sm:$0xff] %vm505_vm2, %v466_v58  ;;  %v325_v3 = vpop.f32.mrf.mxu0  ;;  %v373_v4 = vpop.f32.mrf.mxu1 }
  0xae   :  { %912 = vst.msk [vmem:[#allocation6 + $0x90] sm:$0xff] %vm505_vm2, %v848_v0  ;;  %v864_v5 = vsel %vm736_vm13, %v672_v60, %v800_v62  ;;  %v641_v6 = vadd.f32 %v1222_v8, %v573_v2 }
  0xaf   :  { %928 = vst.msk [vmem:[#allocation6 + $0x110] sm:$0xff] %vm505_vm2, %v864_v5  ;;  %vm752_vm14 = vcmp.ge.f32.partialorder %v688_v1, 0.0  ;;  %v816_v7 = vmul.f32 0.2, %v688_v1  ;;  %v589_v9 = vld [vmem:[#allocation2 + $0x98] sm:$0xff] }
  0xb0   :  { %vm705_vm15 = vcmp.ge.f32.partialorder %v641_v6, 0.0  ;;  %v769_v10 = vmul.f32 0.2, %v641_v6  ;;  %v657_v11 = vadd.f32 %v1222_v8, %v589_v9  ;;  %510 = vst.msk [vmem:[#allocation2 + $0x20] sm:$0xff] %vm505_vm2, %v325_v3 }
  0xb1   :  { %v880_v12 = vsel %vm752_vm14, %v688_v1, %v816_v7  ;;  %526 = vst.msk [vmem:[#allocation2 + $0xa0] sm:$0xff] %vm505_vm2, %v373_v4  ;;  %v421_v13 = vpop.f32.mrf.mxu2  ;;  %v469_v14 = vpop.f32.mrf.mxu3 }
  0xb2   :  { %944 = vst.msk [vmem:[#allocation6 + $0x190] sm:$0xff] %vm505_vm2, %v880_v12  ;;  %v833_v15 = vsel %vm705_vm15, %v641_v6, %v769_v10  ;;  %vm721_vm0 = vcmp.ge.f32.partialorder %v657_v11, 0.0  ;;  %v785_v16 = vmul.f32 0.2, %v657_v11 }
  0xb3   :  { %897 = vst.msk [vmem:[#allocation6 + $0x18] sm:$0xff] %vm505_vm2, %v833_v15  ;;  %v605_v17 = vld [vmem:[#allocation2 + $0x118] sm:$0xff] }
  0xb4   :  { %v849_v18 = vsel %vm721_vm0, %v657_v11, %v785_v16  ;;  %v673_v19 = vadd.f32 %v1222_v8, %v605_v17  ;;  %v621_v20 = vld [vmem:[#allocation2 + $0x198] sm:$0xff]  ;;  %542 = vst.msk [vmem:[#allocation2 + $0x120] sm:$0xff] %vm505_vm2, %v421_v13 }
  0xb5   :  { %913 = vst.msk [vmem:[#allocation6 + $0x98] sm:$0xff] %vm505_vm2, %v849_v18  ;;  %v689_v21 = vadd.f32 %v1222_v8, %v621_v20  ;;  %v328_v22 = vpop.f32.mrf.mxu0  ;;  %v376_v23 = vpop.f32.mrf.mxu1 }
  0xb6   :  { %vm737_vm1 = vcmp.ge.f32.partialorder %v673_v19, 0.0  ;;  %v801_v24 = vmul.f32 0.2, %v673_v19  ;;  %558 = vst.msk [vmem:[#allocation2 + $0x1a0] sm:$0xff] %vm505_vm2, %v469_v14 }
  0xb7   :  { %vm753_vm3 = vcmp.ge.f32.partialorder %v689_v21, 0.0  ;;  %v817_v25 = vmul.f32 0.2, %v689_v21  ;;  %v574_v26 = vld [vmem:[#allocation2 + $0x20] sm:$0xff]  ;;  %511 = vst.msk [vmem:[#allocation2 + $0x28] sm:$0xff] %vm505_vm2, %v328_v22 }
  0xb8   :  { %v865_v27 = vsel %vm737_vm1, %v673_v19, %v801_v24  ;;  %v642_v28 = vadd.f32 %v1222_v8, %v574_v26  ;;  %v590_v29 = vld [vmem:[#allocation2 + $0xa0] sm:$0xff]  ;;  %527 = vst.msk [vmem:[#allocation2 + $0xa8] sm:$0xff] %vm505_vm2, %v376_v23 }
  0xb9   :  { %929 = vst.msk [vmem:[#allocation6 + $0x118] sm:$0xff] %vm505_vm2, %v865_v27  ;;  %v881_v30 = vsel %vm753_vm3, %v689_v21, %v817_v25  ;;  %v658_v31 = vadd.f32 %v1222_v8, %v590_v29  ;;  %v424_v32 = vpop.f32.mrf.mxu2  ;;  %v472_v33 = vpop.f32.mrf.mxu3 }
  0xba   :  { %945 = vst.msk [vmem:[#allocation6 + $0x198] sm:$0xff] %vm505_vm2, %v881_v30  ;;  %vm706_vm4 = vcmp.ge.f32.partialorder %v642_v28, 0.0  ;;  %v770_v34 = vmul.f32 0.2, %v642_v28 }
  0xbb   :  { %vm722_vm5 = vcmp.ge.f32.partialorder %v658_v31, 0.0  ;;  %v786_v35 = vmul.f32 0.2, %v658_v31  ;;  %v606_v36 = vld [vmem:[#allocation2 + $0x120] sm:$0xff]  ;;  %543 = vst.msk [vmem:[#allocation2 + $0x128] sm:$0xff] %vm505_vm2, %v424_v32 }
  0xbc   :  { %v834_v37 = vsel %vm706_vm4, %v642_v28, %v770_v34  ;;  %v674_v38 = vadd.f32 %v1222_v8, %v606_v36  ;;  %559 = vst.msk [vmem:[#allocation2 + $0x1a8] sm:$0xff] %vm505_vm2, %v472_v33 }
  0xbd   :  { %898 = vst.msk [vmem:[#allocation6 + $0x20] sm:$0xff] %vm505_vm2, %v834_v37  ;;  %v850_v39 = vsel %vm722_vm5, %v658_v31, %v786_v35  ;;  %v622_v40 = vld [vmem:[#allocation2 + $0x1a0] sm:$0xff]  ;;  %v331_v41 = vpop.f32.mrf.mxu0  ;;  %v379_v42 = vpop.f32.mrf.mxu1 }
  0xbe   :  { %914 = vst.msk [vmem:[#allocation6 + $0xa0] sm:$0xff] %vm505_vm2, %v850_v39  ;;  %vm738_vm6 = vcmp.ge.f32.partialorder %v674_v38, 0.0  ;;  %v802_v43 = vmul.f32 0.2, %v674_v38  ;;  %v690_v44 = vadd.f32 %v1222_v8, %v622_v40  ;;  %v575_v45 = vld [vmem:[#allocation2 + $0x28] sm:$0xff] }
  0xbf   :  { %v643_v46 = vadd.f32 %v1222_v8, %v575_v45  ;;  %v591_v47 = vld [vmem:[#allocation2 + $0xa8] sm:$0xff]  ;;  %512 = vst.msk [vmem:[#allocation2 + $0x30] sm:$0xff] %vm505_vm2, %v331_v41 }
  0xc0   :  { %v866_v48 = vsel %vm738_vm6, %v674_v38, %v802_v43  ;;  %vm754_vm7 = vcmp.ge.f32.partialorder %v690_v44, 0.0  ;;  %v818_v49 = vmul.f32 0.2, %v690_v44  ;;  %v659_v50 = vadd.f32 %v1222_v8, %v591_v47  ;;  %528 = vst.msk [vmem:[#allocation2 + $0xb0] sm:$0xff] %vm505_vm2, %v379_v42 }
  0xc1   :  { %930 = vst.msk [vmem:[#allocation6 + $0x120] sm:$0xff] %vm505_vm2, %v866_v48  ;;  %vm707_vm8 = vcmp.ge.f32.partialorder %v643_v46, 0.0  ;;  %v771_v51 = vmul.f32 0.2, %v643_v46  ;;  %v427_v52 = vpop.f32.mrf.mxu2  ;;  %v475_v53 = vpop.f32.mrf.mxu3 }
  0xc2   :  { %v882_v54 = vsel %vm754_vm7, %v690_v44, %v818_v49  ;;  %vm723_vm9 = vcmp.ge.f32.partialorder %v659_v50, 0.0  ;;  %v787_v55 = vmul.f32 0.2, %v659_v50  ;;  %v607_v56 = vld [vmem:[#allocation2 + $0x128] sm:$0xff]  ;;  %544 = vst.msk [vmem:[#allocation2 + $0x130] sm:$0xff] %vm505_vm2, %v427_v52 }
  0xc3   :  { %946 = vst.msk [vmem:[#allocation6 + $0x1a0] sm:$0xff] %vm505_vm2, %v882_v54  ;;  %v835_v57 = vsel %vm707_vm8, %v643_v46, %v771_v51  ;;  %v675_v58 = vadd.f32 %v1222_v8, %v607_v56  ;;  %v623_v59 = vld [vmem:[#allocation2 + $0x1a8] sm:$0xff] }
  0xc4   :  { %899 = vst.msk [vmem:[#allocation6 + $0x28] sm:$0xff] %vm505_vm2, %v835_v57  ;;  %v851_v60 = vsel %vm723_vm9, %v659_v50, %v787_v55  ;;  %v691_v61 = vadd.f32 %v1222_v8, %v623_v59 }
  0xc5   :  { %915 = vst.msk [vmem:[#allocation6 + $0xa8] sm:$0xff] %vm505_vm2, %v851_v60  ;;  %vm739_vm10 = vcmp.ge.f32.partialorder %v675_v58, 0.0  ;;  %v803_v62 = vmul.f32 0.2, %v675_v58  ;;  %v334_v63 = vpop.f32.mrf.mxu0  ;;  %v382_v0 = vpop.f32.mrf.mxu1 }
  0xc6   :  { %vm755_vm11 = vcmp.ge.f32.partialorder %v691_v61, 0.0  ;;  %v819_v1 = vmul.f32 0.2, %v691_v61  ;;  %v576_v2 = vld [vmem:[#allocation2 + $0x30] sm:$0xff]  ;;  %560 = vst.msk [vmem:[#allocation2 + $0x1b0] sm:$0xff] %vm505_vm2, %v475_v53 }
  0xc7   :  { %v867_v3 = vsel %vm739_vm10, %v675_v58, %v803_v62  ;;  %v644_v4 = vadd.f32 %v1222_v8, %v576_v2  ;;  %v592_v5 = vld [vmem:[#allocation2 + $0xb0] sm:$0xff]  ;;  %513 = vst.msk [vmem:[#allocation2 + $0x38] sm:$0xff] %vm505_vm2, %v334_v63 }
  0xc8   :  { %931 = vst.msk [vmem:[#allocation6 + $0x128] sm:$0xff] %vm505_vm2, %v867_v3  ;;  %v883_v6 = vsel %vm755_vm11, %v691_v61, %v819_v1  ;;  %v660_v7 = vadd.f32 %v1222_v8, %v592_v5 }
  0xc9   :  { %947 = vst.msk [vmem:[#allocation6 + $0x1a8] sm:$0xff] %vm505_vm2, %v883_v6  ;;  %vm708_vm12 = vcmp.ge.f32.partialorder %v644_v4, 0.0  ;;  %v772_v9 = vmul.f32 0.2, %v644_v4  ;;  %v608_v10 = vld [vmem:[#allocation2 + $0x130] sm:$0xff]  ;;  %v430_v11 = vpop.f32.mrf.mxu2  ;;  %v478_v12 = vpop.f32.mrf.mxu3 }
  0xca   :  { %vm724_vm13 = vcmp.ge.f32.partialorder %v660_v7, 0.0  ;;  %v788_v13 = vmul.f32 0.2, %v660_v7  ;;  %v676_v14 = vadd.f32 %v1222_v8, %v608_v10  ;;  %529 = vst.msk [vmem:[#allocation2 + $0xb8] sm:$0xff] %vm505_vm2, %v382_v0 }
  0xcb   :  { %v836_v15 = vsel %vm708_vm12, %v644_v4, %v772_v9  ;;  %545 = vst.msk [vmem:[#allocation2 + $0x138] sm:$0xff] %vm505_vm2, %v430_v11 }
  0xcc   :  { %900 = vst.msk [vmem:[#allocation6 + $0x30] sm:$0xff] %vm505_vm2, %v836_v15  ;;  %v852_v16 = vsel %vm724_vm13, %v660_v7, %v788_v13  ;;  %vm740_vm14 = vcmp.ge.f32.partialorder %v676_v14, 0.0  ;;  %v804_v17 = vmul.f32 0.2, %v676_v14 }
  0xcd   :  { %916 = vst.msk [vmem:[#allocation6 + $0xb0] sm:$0xff] %vm505_vm2, %v852_v16  ;;  %v624_v18 = vld [vmem:[#allocation2 + $0x1b0] sm:$0xff]  ;;  %v337_v19 = vpop.f32.mrf.mxu0  ;;  %v385_v20 = vpop.f32.mrf.mxu1 }
  0xce   :  { %v868_v21 = vsel %vm740_vm14, %v676_v14, %v804_v17  ;;  %v692_v22 = vadd.f32 %v1222_v8, %v624_v18  ;;  %v577_v23 = vld [vmem:[#allocation2 + $0x38] sm:$0xff]  ;;  %561 = vst.msk [vmem:[#allocation2 + $0x1b8] sm:$0xff] %vm505_vm2, %v478_v12 }
  0xcf   :  { %932 = vst.msk [vmem:[#allocation6 + $0x130] sm:$0xff] %vm505_vm2, %v868_v21  ;;  %v645_v24 = vadd.f32 %v1222_v8, %v577_v23 }
  0xd0   :  { %vm756_vm15 = vcmp.ge.f32.partialorder %v692_v22, 0.0  ;;  %v820_v25 = vmul.f32 0.2, %v692_v22  ;;  %514 = vst.msk [vmem:[#allocation2 + $0x40] sm:$0xff] %vm505_vm2, %v337_v19 }
  0xd1   :  { %vm709_vm0 = vcmp.ge.f32.partialorder %v645_v24, 0.0  ;;  %v773_v26 = vmul.f32 0.2, %v645_v24  ;;  %v593_v27 = vld [vmem:[#allocation2 + $0xb8] sm:$0xff]  ;;  %530 = vst.msk [vmem:[#allocation2 + $0xc0] sm:$0xff] %vm505_vm2, %v385_v20  ;;  %v433_v28 = vpop.f32.mrf.mxu2  ;;  %v481_v29 = vpop.f32.mrf.mxu3 }
  0xd2   :  { %v884_v30 = vsel %vm756_vm15, %v692_v22, %v820_v25  ;;  %v661_v31 = vadd.f32 %v1222_v8, %v593_v27  ;;  %v609_v32 = vld [vmem:[#allocation2 + $0x138] sm:$0xff]  ;;  %546 = vst.msk [vmem:[#allocation2 + $0x140] sm:$0xff] %vm505_vm2, %v433_v28 }
  0xd3   :  { %948 = vst.msk [vmem:[#allocation6 + $0x1b0] sm:$0xff] %vm505_vm2, %v884_v30  ;;  %v837_v33 = vsel %vm709_vm0, %v645_v24, %v773_v26  ;;  %v677_v34 = vadd.f32 %v1222_v8, %v609_v32 }
  0xd4   :  { %901 = vst.msk [vmem:[#allocation6 + $0x38] sm:$0xff] %vm505_vm2, %v837_v33  ;;  %vm725_vm1 = vcmp.ge.f32.partialorder %v661_v31, 0.0  ;;  %v789_v35 = vmul.f32 0.2, %v661_v31 }
  0xd5   :  { %vm741_vm3 = vcmp.ge.f32.partialorder %v677_v34, 0.0  ;;  %v805_v36 = vmul.f32 0.2, %v677_v34  ;;  %v625_v37 = vld [vmem:[#allocation2 + $0x1b8] sm:$0xff]  ;;  %562 = vst.msk [vmem:[#allocation2 + $0x1c0] sm:$0xff] %vm505_vm2, %v481_v29  ;;  %v340_v38 = vpop.f32.mrf.mxu0  ;;  %v388_v39 = vpop.f32.mrf.mxu1 }
  0xd6   :  { %v853_v40 = vsel %vm725_vm1, %v661_v31, %v789_v35  ;;  %v693_v41 = vadd.f32 %v1222_v8, %v625_v37  ;;  %515 = vst.msk [vmem:[#allocation2 + $0x48] sm:$0xff] %vm505_vm2, %v340_v38 }
  0xd7   :  { %917 = vst.msk [vmem:[#allocation6 + $0xb8] sm:$0xff] %vm505_vm2, %v853_v40  ;;  %v869_v42 = vsel %vm741_vm3, %v677_v34, %v805_v36  ;;  %v578_v43 = vld [vmem:[#allocation2 + $0x40] sm:$0xff] }
  0xd8   :  { %933 = vst.msk [vmem:[#allocation6 + $0x138] sm:$0xff] %vm505_vm2, %v869_v42  ;;  %vm757_vm4 = vcmp.ge.f32.partialorder %v693_v41, 0.0  ;;  %v821_v44 = vmul.f32 0.2, %v693_v41  ;;  %v646_v45 = vadd.f32 %v1222_v8, %v578_v43  ;;  %v594_v46 = vld [vmem:[#allocation2 + $0xc0] sm:$0xff] }
  0xd9   :  { %v662_v47 = vadd.f32 %v1222_v8, %v594_v46  ;;  %v610_v48 = vld [vmem:[#allocation2 + $0x140] sm:$0xff]  ;;  %531 = vst.msk [vmem:[#allocation2 + $0xc8] sm:$0xff] %vm505_vm2, %v388_v39  ;;  %v436_v49 = vpop.f32.mrf.mxu2  ;;  %v484_v50 = vpop.f32.mrf.mxu3 }
  0xda   :  { %v885_v51 = vsel %vm757_vm4, %v693_v41, %v821_v44  ;;  %vm710_vm5 = vcmp.ge.f32.partialorder %v646_v45, 0.0  ;;  %v774_v52 = vmul.f32 0.2, %v646_v45  ;;  %v678_v53 = vadd.f32 %v1222_v8, %v610_v48  ;;  %547 = vst.msk [vmem:[#allocation2 + $0x148] sm:$0xff] %vm505_vm2, %v436_v49 }
  0xdb   :  { %949 = vst.msk [vmem:[#allocation6 + $0x1b8] sm:$0xff] %vm505_vm2, %v885_v51  ;;  %vm726_vm6 = vcmp.ge.f32.partialorder %v662_v47, 0.0  ;;  %v790_v54 = vmul.f32 0.2, %v662_v47 }
  0xdc   :  { %v838_v55 = vsel %vm710_vm5, %v646_v45, %v774_v52  ;;  %vm742_vm7 = vcmp.ge.f32.partialorder %v678_v53, 0.0  ;;  %v806_v56 = vmul.f32 0.2, %v678_v53  ;;  %v626_v57 = vld [vmem:[#allocation2 + $0x1c0] sm:$0xff]  ;;  %563 = vst.msk [vmem:[#allocation2 + $0x1c8] sm:$0xff] %vm505_vm2, %v484_v50 }
  0xdd   :  { %902 = vst.msk [vmem:[#allocation6 + $0x40] sm:$0xff] %vm505_vm2, %v838_v55  ;;  %v854_v58 = vsel %vm726_vm6, %v662_v47, %v790_v54  ;;  %v694_v59 = vadd.f32 %v1222_v8, %v626_v57  ;;  %v579_v60 = vld [vmem:[#allocation2 + $0x48] sm:$0xff]  ;;  %v343_v61 = vpop.f32.mrf.mxu0  ;;  %v391_v62 = vpop.f32.mrf.mxu1 }
  0xde   :  { %918 = vst.msk [vmem:[#allocation6 + $0xc0] sm:$0xff] %vm505_vm2, %v854_v58  ;;  %v870_v63 = vsel %vm742_vm7, %v678_v53, %v806_v56  ;;  %v647_v0 = vadd.f32 %v1222_v8, %v579_v60 }
  0xdf   :  { %934 = vst.msk [vmem:[#allocation6 + $0x140] sm:$0xff] %vm505_vm2, %v870_v63  ;;  %vm758_vm8 = vcmp.ge.f32.partialorder %v694_v59, 0.0  ;;  %v822_v1 = vmul.f32 0.2, %v694_v59 }
  0xe0   :  { %vm711_vm9 = vcmp.ge.f32.partialorder %v647_v0, 0.0  ;;  %v775_v2 = vmul.f32 0.2, %v647_v0  ;;  %v595_v3 = vld [vmem:[#allocation2 + $0xc8] sm:$0xff]  ;;  %516 = vst.msk [vmem:[#allocation2 + $0x50] sm:$0xff] %vm505_vm2, %v343_v61 }
  0xe1   :  { %v886_v4 = vsel %vm758_vm8, %v694_v59, %v822_v1  ;;  %v663_v5 = vadd.f32 %v1222_v8, %v595_v3  ;;  %v611_v6 = vld [vmem:[#allocation2 + $0x148] sm:$0xff]  ;;  %532 = vst.msk [vmem:[#allocation2 + $0xd0] sm:$0xff] %vm505_vm2, %v391_v62  ;;  %v439_v7 = vpop.f32.mrf.mxu2  ;;  %v487_v9 = vpop.f32.mrf.mxu3 }
  0xe2   :  { %950 = vst.msk [vmem:[#allocation6 + $0x1c0] sm:$0xff] %vm505_vm2, %v886_v4  ;;  %v839_v10 = vsel %vm711_vm9, %v647_v0, %v775_v2  ;;  %v679_v11 = vadd.f32 %v1222_v8, %v611_v6 }
  0xe3   :  { %903 = vst.msk [vmem:[#allocation6 + $0x48] sm:$0xff] %vm505_vm2, %v839_v10  ;;  %vm727_vm10 = vcmp.ge.f32.partialorder %v663_v5, 0.0  ;;  %v791_v12 = vmul.f32 0.2, %v663_v5  ;;  %v627_v13 = vld [vmem:[#allocation2 + $0x1c8] sm:$0xff] }
  0xe4   :  { %vm743_vm11 = vcmp.ge.f32.partialorder %v679_v11, 0.0  ;;  %v807_v14 = vmul.f32 0.2, %v679_v11  ;;  %v695_v15 = vadd.f32 %v1222_v8, %v627_v13  ;;  %548 = vst.msk [vmem:[#allocation2 + $0x150] sm:$0xff] %vm505_vm2, %v439_v7 }
  0xe5   :  { %v855_v16 = vsel %vm727_vm10, %v663_v5, %v791_v12  ;;  %564 = vst.msk [vmem:[#allocation2 + $0x1d0] sm:$0xff] %vm505_vm2, %v487_v9  ;;  %v346_v17 = vpop.f32.mrf.mxu0  ;;  %v394_v18 = vpop.f32.mrf.mxu1 }
  0xe6   :  { %919 = vst.msk [vmem:[#allocation6 + $0xc8] sm:$0xff] %vm505_vm2, %v855_v16  ;;  %v871_v19 = vsel %vm743_vm11, %v679_v11, %v807_v14  ;;  %vm759_vm12 = vcmp.ge.f32.partialorder %v695_v15, 0.0  ;;  %v823_v20 = vmul.f32 0.2, %v695_v15 }
  0xe7   :  { %935 = vst.msk [vmem:[#allocation6 + $0x148] sm:$0xff] %vm505_vm2, %v871_v19  ;;  %v580_v21 = vld [vmem:[#allocation2 + $0x50] sm:$0xff] }
  0xe8   :  { %v887_v22 = vsel %vm759_vm12, %v695_v15, %v823_v20  ;;  %v648_v23 = vadd.f32 %v1222_v8, %v580_v21  ;;  %v596_v24 = vld [vmem:[#allocation2 + $0xd0] sm:$0xff]  ;;  %517 = vst.msk [vmem:[#allocation2 + $0x58] sm:$0xff] %vm505_vm2, %v346_v17 }
  0xe9   :  { %951 = vst.msk [vmem:[#allocation6 + $0x1c8] sm:$0xff] %vm505_vm2, %v887_v22  ;;  %v664_v25 = vadd.f32 %v1222_v8, %v596_v24  ;;  %v442_v26 = vpop.f32.mrf.mxu2  ;;  %v490_v27 = vpop.f32.mrf.mxu3 }
  0xea   :  { %vm712_vm13 = vcmp.ge.f32.partialorder %v648_v23, 0.0  ;;  %v776_v28 = vmul.f32 0.2, %v648_v23  ;;  %533 = vst.msk [vmem:[#allocation2 + $0xd8] sm:$0xff] %vm505_vm2, %v394_v18 }
  0xeb   :  { %vm728_vm14 = vcmp.ge.f32.partialorder %v664_v25, 0.0  ;;  %v792_v29 = vmul.f32 0.2, %v664_v25  ;;  %v612_v30 = vld [vmem:[#allocation2 + $0x150] sm:$0xff]  ;;  %549 = vst.msk [vmem:[#allocation2 + $0x158] sm:$0xff] %vm505_vm2, %v442_v26 }
  0xec   :  { %v840_v31 = vsel %vm712_vm13, %v648_v23, %v776_v28  ;;  %v680_v32 = vadd.f32 %v1222_v8, %v612_v30  ;;  %v628_v33 = vld [vmem:[#allocation2 + $0x1d0] sm:$0xff]  ;;  %565 = vst.msk [vmem:[#allocation2 + $0x1d8] sm:$0xff] %vm505_vm2, %v490_v27 }
  0xed   :  { %904 = vst.msk [vmem:[#allocation6 + $0x50] sm:$0xff] %vm505_vm2, %v840_v31  ;;  %v856_v34 = vsel %vm728_vm14, %v664_v25, %v792_v29  ;;  %v696_v35 = vadd.f32 %v1222_v8, %v628_v33  ;;  %v349_v36 = vpop.f32.mrf.mxu0  ;;  %v397_v37 = vpop.f32.mrf.mxu1 }
  0xee   :  { %920 = vst.msk [vmem:[#allocation6 + $0xd0] sm:$0xff] %vm505_vm2, %v856_v34  ;;  %vm744_vm15 = vcmp.ge.f32.partialorder %v680_v32, 0.0  ;;  %v808_v38 = vmul.f32 0.2, %v680_v32 }
  0xef   :  { %vm760_vm0 = vcmp.ge.f32.partialorder %v696_v35, 0.0  ;;  %v824_v39 = vmul.f32 0.2, %v696_v35  ;;  %v581_v40 = vld [vmem:[#allocation2 + $0x58] sm:$0xff]  ;;  %518 = vst.msk [vmem:[#allocation2 + $0x60] sm:$0xff] %vm505_vm2, %v349_v36 }
  0xf0   :  { %v872_v41 = vsel %vm744_vm15, %v680_v32, %v808_v38  ;;  %v649_v42 = vadd.f32 %v1222_v8, %v581_v40  ;;  %534 = vst.msk [vmem:[#allocation2 + $0xe0] sm:$0xff] %vm505_vm2, %v397_v37 }
  0xf1   :  { %936 = vst.msk [vmem:[#allocation6 + $0x150] sm:$0xff] %vm505_vm2, %v872_v41  ;;  %v888_v43 = vsel %vm760_vm0, %v696_v35, %v824_v39  ;;  %v597_v44 = vld [vmem:[#allocation2 + $0xd8] sm:$0xff]  ;;  %v445_v45 = vpop.f32.mrf.mxu2  ;;  %v493_v46 = vpop.f32.mrf.mxu3 }
  0xf2   :  { %952 = vst.msk [vmem:[#allocation6 + $0x1d0] sm:$0xff] %vm505_vm2, %v888_v43  ;;  %vm713_vm1 = vcmp.ge.f32.partialorder %v649_v42, 0.0  ;;  %v777_v47 = vmul.f32 0.2, %v649_v42  ;;  %v665_v48 = vadd.f32 %v1222_v8, %v597_v44  ;;  %v613_v49 = vld [vmem:[#allocation2 + $0x158] sm:$0xff] }
  0xf3   :  { %v681_v50 = vadd.f32 %v1222_v8, %v613_v49  ;;  %v629_v51 = vld [vmem:[#allocation2 + $0x1d8] sm:$0xff]  ;;  %550 = vst.msk [vmem:[#allocation2 + $0x160] sm:$0xff] %vm505_vm2, %v445_v45 }
  0xf4   :  { %v841_v52 = vsel %vm713_vm1, %v649_v42, %v777_v47  ;;  %vm729_vm3 = vcmp.ge.f32.partialorder %v665_v48, 0.0  ;;  %v793_v53 = vmul.f32 0.2, %v665_v48  ;;  %v697_v54 = vadd.f32 %v1222_v8, %v629_v51  ;;  %566 = vst.msk [vmem:[#allocation2 + $0x1e0] sm:$0xff] %vm505_vm2, %v493_v46 }
  0xf5   :  { %905 = vst.msk [vmem:[#allocation6 + $0x58] sm:$0xff] %vm505_vm2, %v841_v52  ;;  %vm745_vm4 = vcmp.ge.f32.partialorder %v681_v50, 0.0  ;;  %v809_v55 = vmul.f32 0.2, %v681_v50  ;;  %v352_v56 = vpop.f32.mrf.mxu0  ;;  %v400_v57 = vpop.f32.mrf.mxu1 }
  0xf6   :  { %v857_v58 = vsel %vm729_vm3, %v665_v48, %v793_v53  ;;  %vm761_vm5 = vcmp.ge.f32.partialorder %v697_v54, 0.0  ;;  %v825_v59 = vmul.f32 0.2, %v697_v54  ;;  %v582_v60 = vld [vmem:[#allocation2 + $0x60] sm:$0xff]  ;;  %519 = vst.msk [vmem:[#allocation2 + $0x68] sm:$0xff] %vm505_vm2, %v352_v56 }
  0xf7   :  { %921 = vst.msk [vmem:[#allocation6 + $0xd8] sm:$0xff] %vm505_vm2, %v857_v58  ;;  %v873_v61 = vsel %vm745_vm4, %v681_v50, %v809_v55  ;;  %v650_v62 = vadd.f32 %v1222_v8, %v582_v60  ;;  %v598_v63 = vld [vmem:[#allocation2 + $0xe0] sm:$0xff] }
  0xf8   :  { %937 = vst.msk [vmem:[#allocation6 + $0x158] sm:$0xff] %vm505_vm2, %v873_v61  ;;  %v889_v0 = vsel %vm761_vm5, %v697_v54, %v825_v59  ;;  %v666_v1 = vadd.f32 %v1222_v8, %v598_v63 }
  0xf9   :  { %953 = vst.msk [vmem:[#allocation6 + $0x1d8] sm:$0xff] %vm505_vm2, %v889_v0  ;;  %vm714_vm6 = vcmp.ge.f32.partialorder %v650_v62, 0.0  ;;  %v778_v2 = vmul.f32 0.2, %v650_v62  ;;  %v448_v3 = vpop.f32.mrf.mxu2  ;;  %v496_v4 = vpop.f32.mrf.mxu3 }
  0xfa   :  { %vm730_vm7 = vcmp.ge.f32.partialorder %v666_v1, 0.0  ;;  %v794_v5 = vmul.f32 0.2, %v666_v1  ;;  %v614_v6 = vld [vmem:[#allocation2 + $0x160] sm:$0xff]  ;;  %535 = vst.msk [vmem:[#allocation2 + $0xe8] sm:$0xff] %vm505_vm2, %v400_v57 }
  0xfb   :  { %v842_v7 = vsel %vm714_vm6, %v650_v62, %v778_v2  ;;  %v682_v9 = vadd.f32 %v1222_v8, %v614_v6  ;;  %v630_v10 = vld [vmem:[#allocation2 + $0x1e0] sm:$0xff]  ;;  %551 = vst.msk [vmem:[#allocation2 + $0x168] sm:$0xff] %vm505_vm2, %v448_v3 }
  0xfc   :  { %906 = vst.msk [vmem:[#allocation6 + $0x60] sm:$0xff] %vm505_vm2, %v842_v7  ;;  %v858_v11 = vsel %vm730_vm7, %v666_v1, %v794_v5  ;;  %v698_v12 = vadd.f32 %v1222_v8, %v630_v10 }
  0xfd   :  { %922 = vst.msk [vmem:[#allocation6 + $0xe0] sm:$0xff] %vm505_vm2, %v858_v11  ;;  %vm746_vm8 = vcmp.ge.f32.partialorder %v682_v9, 0.0  ;;  %v810_v13 = vmul.f32 0.2, %v682_v9  ;;  %v583_v14 = vld [vmem:[#allocation2 + $0x68] sm:$0xff]  ;;  %v355_v15 = vpop.f32.mrf.mxu0  ;;  %v403_v16 = vpop.f32.mrf.mxu1 }
  0xfe   :  { %vm762_vm9 = vcmp.ge.f32.partialorder %v698_v12, 0.0  ;;  %v826_v17 = vmul.f32 0.2, %v698_v12  ;;  %v651_v18 = vadd.f32 %v1222_v8, %v583_v14  ;;  %567 = vst.msk [vmem:[#allocation2 + $0x1e8] sm:$0xff] %vm505_vm2, %v496_v4 }
  0xff   :  { %v874_v19 = vsel %vm746_vm8, %v682_v9, %v810_v13  ;;  %520 = vst.msk [vmem:[#allocation2 + $0x70] sm:$0xff] %vm505_vm2, %v355_v15 }
 0x100   :  { %938 = vst.msk [vmem:[#allocation6 + $0x160] sm:$0xff] %vm505_vm2, %v874_v19  ;;  %v890_v20 = vsel %vm762_vm9, %v698_v12, %v826_v17  ;;  %vm715_vm10 = vcmp.ge.f32.partialorder %v651_v18, 0.0  ;;  %v779_v21 = vmul.f32 0.2, %v651_v18 }
 0x101   :  { %954 = vst.msk [vmem:[#allocation6 + $0x1e0] sm:$0xff] %vm505_vm2, %v890_v20  ;;  %v599_v22 = vld [vmem:[#allocation2 + $0xe8] sm:$0xff]  ;;  %v451_v23 = vpop.f32.mrf.mxu2  ;;  %v499_v24 = vpop.f32.mrf.mxu3 }
 0x102   :  { %v843_v25 = vsel %vm715_vm10, %v651_v18, %v779_v21  ;;  %v667_v26 = vadd.f32 %v1222_v8, %v599_v22  ;;  %v615_v27 = vld [vmem:[#allocation2 + $0x168] sm:$0xff]  ;;  %536 = vst.msk [vmem:[#allocation2 + $0xf0] sm:$0xff] %vm505_vm2, %v403_v16 }
 0x103   :  { %907 = vst.msk [vmem:[#allocation6 + $0x68] sm:$0xff] %vm505_vm2, %v843_v25  ;;  %v683_v28 = vadd.f32 %v1222_v8, %v615_v27 }
 0x104   :  { %vm731_vm11 = vcmp.ge.f32.partialorder %v667_v26, 0.0  ;;  %v795_v29 = vmul.f32 0.2, %v667_v26  ;;  %552 = vst.msk [vmem:[#allocation2 + $0x170] sm:$0xff] %vm505_vm2, %v451_v23 }
 0x105   :  { %vm747_vm12 = vcmp.ge.f32.partialorder %v683_v28, 0.0  ;;  %v811_v30 = vmul.f32 0.2, %v683_v28  ;;  %v631_v31 = vld [vmem:[#allocation2 + $0x1e8] sm:$0xff]  ;;  %568 = vst.msk [vmem:[#allocation2 + $0x1f0] sm:$0xff] %vm505_vm2, %v499_v24  ;;  %v358_v32 = vpop.f32.mrf.mxu0  ;;  %v406_v36 = vpop.f32.mrf.mxu1 }
 0x106   :  { %v859_v33 = vsel %vm731_vm11, %v667_v26, %v795_v29  ;;  %v699_v34 = vadd.f32 %v1222_v8, %v631_v31  ;;  %v584_v35 = vld [vmem:[#allocation2 + $0x70] sm:$0xff]  ;;  %521 = vst.msk [vmem:[#allocation2 + $0x78] sm:$0xff] %vm505_vm2, %v358_v32 }
 0x107   :  { %923 = vst.msk [vmem:[#allocation6 + $0xe8] sm:$0xff] %vm505_vm2, %v859_v33  ;;  %v875_v37 = vsel %vm747_vm12, %v683_v28, %v811_v30  ;;  %v652_v38 = vadd.f32 %v1222_v8, %v584_v35 }
 0x108   :  { %939 = vst.msk [vmem:[#allocation6 + $0x168] sm:$0xff] %vm505_vm2, %v875_v37  ;;  %vm763_vm13 = vcmp.ge.f32.partialorder %v699_v34, 0.0  ;;  %v827_v39 = vmul.f32 0.2, %v699_v34 }
 0x109   :  { %vm716_vm14 = vcmp.ge.f32.partialorder %v652_v38, 0.0  ;;  %v780_v40 = vmul.f32 0.2, %v652_v38  ;;  %v600_v41 = vld [vmem:[#allocation2 + $0xf0] sm:$0xff]  ;;  %537 = vst.msk [vmem:[#allocation2 + $0xf8] sm:$0xff] %vm505_vm2, %v406_v36  ;;  %v454_v42 = vpop.f32.mrf.mxu2  ;;  %v502_v45 = vpop.f32.mrf.mxu3 }
 0x10a   :  { %v891_v43 = vsel %vm763_vm13, %v699_v34, %v827_v39  ;;  %v668_v44 = vadd.f32 %v1222_v8, %v600_v41  ;;  %553 = vst.msk [vmem:[#allocation2 + $0x178] sm:$0xff] %vm505_vm2, %v454_v42 }
 0x10b   :  { %955 = vst.msk [vmem:[#allocation6 + $0x1e8] sm:$0xff] %vm505_vm2, %v891_v43  ;;  %v844_v46 = vsel %vm716_vm14, %v652_v38, %v780_v40  ;;  %v616_v47 = vld [vmem:[#allocation2 + $0x170] sm:$0xff] }
 0x10c   :  { %908 = vst.msk [vmem:[#allocation6 + $0x70] sm:$0xff] %vm505_vm2, %v844_v46  ;;  %vm732_vm15 = vcmp.ge.f32.partialorder %v668_v44, 0.0  ;;  %v796_v48 = vmul.f32 0.2, %v668_v44  ;;  %v684_v49 = vadd.f32 %v1222_v8, %v616_v47  ;;  %v632_v50 = vld [vmem:[#allocation2 + $0x1f0] sm:$0xff] }
 0x10d   :  { %v700_v51 = vadd.f32 %v1222_v8, %v632_v50  ;;  %v585_v52 = vld [vmem:[#allocation2 + $0x78] sm:$0xff]  ;;  %569 = vst.msk [vmem:[#allocation2 + $0x1f8] sm:$0xff] %vm505_vm2, %v502_v45 }
 0x10e   :  { %v860_v53 = vsel %vm732_vm15, %v668_v44, %v796_v48  ;;  %vm748_vm0 = vcmp.ge.f32.partialorder %v684_v49, 0.0  ;;  %v812_v54 = vmul.f32 0.2, %v684_v49  ;;  %v653_v55 = vadd.f32 %v1222_v8, %v585_v52 }
 0x10f   :  { %924 = vst.msk [vmem:[#allocation6 + $0xf0] sm:$0xff] %vm505_vm2, %v860_v53  ;;  %vm764_vm1 = vcmp.ge.f32.partialorder %v700_v51, 0.0  ;;  %v828_v56 = vmul.f32 0.2, %v700_v51 }
 0x110   :  { %v876_v57 = vsel %vm748_vm0, %v684_v49, %v812_v54  ;;  %vm717_vm3 = vcmp.ge.f32.partialorder %v653_v55, 0.0  ;;  %v781_v58 = vmul.f32 0.2, %v653_v55  ;;  %v601_v59 = vld [vmem:[#allocation2 + $0xf8] sm:$0xff] }
 0x111   :  { %940 = vst.msk [vmem:[#allocation6 + $0x170] sm:$0xff] %vm505_vm2, %v876_v57  ;;  %v892_v60 = vsel %vm764_vm1, %v700_v51, %v828_v56  ;;  %v669_v61 = vadd.f32 %v1222_v8, %v601_v59  ;;  %v617_v62 = vld [vmem:[#allocation2 + $0x178] sm:$0xff] }
 0x112   :  { %956 = vst.msk [vmem:[#allocation6 + $0x1f0] sm:$0xff] %vm505_vm2, %v892_v60  ;;  %v845_v63 = vsel %vm717_vm3, %v653_v55, %v781_v58  ;;  %v685_v0 = vadd.f32 %v1222_v8, %v617_v62 }
 0x113   :  { %909 = vst.msk [vmem:[#allocation6 + $0x78] sm:$0xff] %vm505_vm2, %v845_v63  ;;  %vm733_vm4 = vcmp.ge.f32.partialorder %v669_v61, 0.0  ;;  %v797_v1 = vmul.f32 0.2, %v669_v61 }
 0x114   :  { %vm749_vm5 = vcmp.ge.f32.partialorder %v685_v0, 0.0  ;;  %v813_v2 = vmul.f32 0.2, %v685_v0  ;;  %v633_v3 = vld [vmem:[#allocation2 + $0x1f8] sm:$0xff] }
 0x115   :  { %v861_v4 = vsel %vm733_vm4, %v669_v61, %v797_v1  ;;  %v701_v5 = vadd.f32 %v1222_v8, %v633_v3 }
 0x116   :  { %925 = vst.msk [vmem:[#allocation6 + $0xf8] sm:$0xff] %vm505_vm2, %v861_v4  ;;  %v877_v6 = vsel %vm749_vm5, %v685_v0, %v813_v2 }
 0x117   :  { %941 = vst.msk [vmem:[#allocation6 + $0x178] sm:$0xff] %vm505_vm2, %v877_v6  ;;  %vm765_vm6 = vcmp.ge.f32.partialorder %v701_v5, 0.0  ;;  %v829_v7 = vmul.f32 0.2, %v701_v5 }
 0x119   :  { %v893_v9 = vsel %vm765_vm6, %v701_v5, %v829_v7 }
 0x11a   :  { %957 = vst.msk [vmem:[#allocation6 + $0x1f8] sm:$0xff] %vm505_vm2, %v893_v9 }
 0x11b   :  { %970 = dma.vmem_to_hbm [thread:$0]  %s963_s27, 8192, %s965_s30, [#allocation5], %s1112_s17, %s1112_s17, %s1113_s18  }
 0x11c   :  { %1109 = dma.done.wait [#allocation5], 8192  }
 0x11d   :  { %1110 = vsyncadd [#allocation5], 4294959104 }
 0x11e   :  { %975 = vsyncpa [#allocation4], 1 }
 0x11f   :  { %976 = vsyncpa [#allocation5], 1 }

</bundles_post_ra>
